<compile_context>
chip_gen: v6e
topology: v6e:2x2x1
jax: 0.10.0
libtpu: 0.0.40
codegen_flags: <defaults>
</compile_context>

<pallas_src>
import functools
import math

import jax
import jax.numpy as jnp
from jax import lax
from jax.experimental import pallas as pl
from jax.experimental.pallas import tpu as pltpu


def _round_up(x, m):
    return ((x + m - 1) // m) * m


def _cdiv(a, b):
    return (a + b - 1) // b


_INV_SQRT2 = 1.0 / math.sqrt(2.0)


def _gelu_exact(h):
    # torch.nn.GELU() default = exact (erf-based) GELU; computed in f32.
    return 0.5 * h * (1.0 + lax.erf(h * _INV_SQRT2))


def _vmem_capacity_bytes():
    try:
        cap = getattr(pltpu.get_tpu_info(), "vmem_capacity_bytes", None)
        if cap:
            return int(cap)
    except Exception:
        pass
    return 64 << 20  # conservative fallback = v7x per-TensorCore VMEM


# ----------------------------------------------------------------------------- kernels
def _ff_fused_kernel(x_ref, w1_ref, b1_ref, w2_ref, b2_ref, o_ref):
    # x_ref: (tm, dim_p); w1_ref: (dim_p, hidden_p); b1_ref: (1, hidden_p)
    # w2_ref: (hidden_p, dim_p); b2_ref: (1, dim_p); o_ref: (tm, dim_p)
    # Weights/biases are grid-invariant: fetched from HBM once, reused per row tile.
    h = jnp.dot(x_ref[...], w1_ref[...], preferred_element_type=jnp.float32)
    h = _gelu_exact(h + b1_ref[...])
    # Dropout(p=0.0) is identity.
    y = jnp.dot(h.astype(w2_ref.dtype), w2_ref[...],
                preferred_element_type=jnp.float32)
    o_ref[...] = (y + b2_ref[...]).astype(o_ref.dtype)


def _ff_tiled_kernel(x_ref, w1_ref, b1_ref, w2_ref, b2_ref, o_ref, acc_ref, *, th):
    # Hidden dimension tiled as the last ("arbitrary") grid axis.
    # x_ref: (tm, dim_p); w1_ref: (dim_p, th); b1_ref: (1, hidden_pad) resident
    # w2_ref: (th, dim_p); b2_ref: (1, dim_p); acc_ref: (tm, dim_p) f32 scratch.
    j = pl.program_id(1)

    # Resident b1, sliced in VMEM (no per-step tiny DMA). j*th is a 128-multiple.
    b1 = b1_ref[:, pl.ds(pl.multiple_of(j * th, 128), th)]

    h = jnp.dot(x_ref[...], w1_ref[...], preferred_element_type=jnp.float32)
    h = _gelu_exact(h + b1)
    part = jnp.dot(h.astype(w2_ref.dtype), w2_ref[...],
                   preferred_element_type=jnp.float32)

    @pl.when(j == 0)
    def _():  # first hidden slice: store (no zero-init + read-modify-write)
        acc_ref[...] = part

    @pl.when(j > 0)
    def _():
        acc_ref[...] += part

    @pl.when(j == pl.num_programs(1) - 1)
    def _():
        o_ref[...] = (acc_ref[...] + b2_ref[...]).astype(o_ref.dtype)


# ----------------------------------------------------------------------------- wrapper
def feed_forward(x, w1, b1, w2, b2, *, tm=1024, th=512, force_tiled=False):
    """x: (B, S, dim). w1: (dim, hidden), b1: (hidden,), w2: (hidden, dim), b2: (dim,).

    Weights are stored (in, out) — transpose of torch.nn.Linear.weight — so the kernel
    computes y = GELU(x @ W1 + b1) @ W2 + b2 directly.
    """
    B, S, dim = x.shape
    hidden = w1.shape[1]
    M = B * S
    dtype = x.dtype
    x_isz = jnp.dtype(dtype).itemsize
    w_isz = jnp.dtype(w1.dtype).itemsize

    # Lane-dense padding (last dims -> multiples of 128); sublane multiple by dtype.
    dim_p = _round_up(dim, 128)
    hidden_p = _round_up(hidden, 128)
    sub = 8 * max(1, 4 // x_isz)  # 8 for f32, 16 for bf16

    # Row tile: large to amortize weight streaming / per-step overhead, but halved
    # until there are >= 2 row tiles so both v7x TensorCores get work.
    tm = _round_up(min(tm, _round_up(M, sub)), sub)
    while _round_up(M, tm) // tm < 2 and tm >= 256:
        tm = _round_up(tm // 2, sub)

    cap = _vmem_capacity_bytes()             # 64 MiB (v7x) / 128 MiB (v5e, v6e)
    fit_budget = int(0.80 * cap)

    def fused_need(tm_):
        return (2 * tm_ * dim_p * x_isz            # x tiles (double buffered)
                + 2 * tm_ * dim_p * x_isz          # out tiles
                + 2 * dim_p * hidden_p * w_isz     # W1 (resident; 2 bufs budgeted)
                + 2 * hidden_p * dim_p * w_isz     # W2
                + 2 * 8 * hidden_p * w_isz         # b1 (sublane padded)
                + 2 * 8 * dim_p * w_isz            # b2
                + tm_ * hidden_p * 4               # f32 hidden activations
                + tm_ * dim_p * 4)                 # f32 output before cast

    def tiled_need(tm_, th_, hp_):
        return (2 * tm_ * dim_p * x_isz
                + 2 * tm_ * dim_p * x_isz
                + 2 * dim_p * th_ * w_isz
                + 2 * th_ * dim_p * w_isz
                + 2 * 8 * hp_ * w_isz              # full b1 resident
                + 2 * 8 * dim_p * w_isz
                + tm_ * dim_p * 4                  # f32 accumulator scratch
                + tm_ * th_ * 4                    # f32 hidden slice
                + tm_ * dim_p * 4)                 # f32 partial product

    # Prefer the fused path (weights DMA'd once); shrink tm if needed to make it fit.
    use_fused = False
    if not force_tiled:
        cand = tm
        while cand >= sub:
            if fused_need(cand) <= fit_budget:
                use_fused, tm = True, cand
                break
            if cand <= 128:
                break
            cand = _round_up(cand // 2, sub)

    if use_fused:
        hidden_pad = hidden_p
        n_j = 1
        need = fused_need(tm)
    else:
        # th: a 128-multiple that divides the padded hidden (keeps dead columns < 128*n_j).
        th = min(max(th, 128), hidden_p)
        n_j = _cdiv(hidden_p, th)
        th = _round_up(_cdiv(hidden_p, n_j), 128)
        hidden_pad = n_j * th
        need = tiled_need(tm, th, hidden_pad)
        while need > fit_budget and tm > sub:
            tm = max(sub, _round_up(tm // 2, sub))
            need = tiled_need(tm, th, hidden_pad)

    M_p = _round_up(max(M, 1), tm)

    # Zero-pad only when actually required (skip HBM copies for aligned ViT shapes).
    # Padded hidden columns give GELU(0)=0 and padded W2 rows are zero, so padding
    # contributes nothing; padded rows/output columns are sliced off.
    x2d = x.reshape(M, dim)
    if M_p != M or dim_p != dim:
        x2d = jnp.zeros((M_p, dim_p), dtype).at[:M, :dim].set(x2d)
    if dim_p != dim or hidden_pad != hidden:
        w1p = jnp.zeros((dim_p, hidden_pad), w1.dtype).at[:dim, :hidden].set(w1)
        w2p = jnp.zeros((hidden_pad, dim_p), w2.dtype).at[:hidden, :dim].set(w2)
    else:
        w1p, w2p = w1, w2
    b1p = (b1.reshape(1, hidden) if hidden_pad == hidden
           else jnp.zeros((1, hidden_pad), b1.dtype).at[0, :hidden].set(b1))
    b2p = (b2.reshape(1, dim) if dim_p == dim
           else jnp.zeros((1, dim_p), b2.dtype).at[0, :dim].set(b2))

    # Limit clamped to chip capacity (need <= 0.8*cap by construction).
    vmem_limit = int(min(0.90 * cap, max(1.3 * need + (16 << 20), 64 << 20)))

    cost = pl.CostEstimate(
        flops=4 * M * dim * hidden,
        transcendentals=M * hidden,
        bytes_accessed=(M * dim + dim * hidden + hidden
                        + hidden * dim + dim + M * dim) * x_isz,
    )

    out_shape = jax.ShapeDtypeStruct((M_p, dim_p), dtype)

    if use_fused:
        out2d = pl.pallas_call(
            _ff_fused_kernel,
            out_shape=out_shape,
            grid_spec=pltpu.PrefetchScalarGridSpec(
                num_scalar_prefetch=0,
                grid=(M_p // tm,),
                in_specs=[
                    pl.BlockSpec((tm, dim_p), lambda i: (i, 0)),          # x row tile
                    pl.BlockSpec((dim_p, hidden_pad), lambda i: (0, 0)),  # W1 resident
                    pl.BlockSpec((1, hidden_pad), lambda i: (0, 0)),      # b1 resident
                    pl.BlockSpec((hidden_pad, dim_p), lambda i: (0, 0)),  # W2 resident
                    pl.BlockSpec((1, dim_p), lambda i: (0, 0)),           # b2 resident
                ],
                out_specs=pl.BlockSpec((tm, dim_p), lambda i: (i, 0)),
            ),
            compiler_params=pltpu.CompilerParams(
                dimension_semantics=("parallel",),
                vmem_limit_bytes=vmem_limit,
            ),
            cost_estimate=cost,
        )(x2d, w1p, b1p, w2p, b2p)
    else:
        out2d = pl.pallas_call(
            functools.partial(_ff_tiled_kernel, th=th),
            out_shape=out_shape,
            grid_spec=pltpu.PrefetchScalarGridSpec(
                num_scalar_prefetch=0,
                grid=(M_p // tm, n_j),
                in_specs=[
                    pl.BlockSpec((tm, dim_p), lambda i, j: (i, 0)),       # x row tile
                    pl.BlockSpec((dim_p, th), lambda i, j: (0, j)),       # W1 hidden slice
                    pl.BlockSpec((1, hidden_pad), lambda i, j: (0, 0)),   # b1 resident
                    pl.BlockSpec((th, dim_p), lambda i, j: (j, 0)),       # W2 hidden slice
                    pl.BlockSpec((1, dim_p), lambda i, j: (0, 0)),        # b2 resident
                ],
                out_specs=pl.BlockSpec((tm, dim_p), lambda i, j: (i, 0)),
                scratch_shapes=[pltpu.VMEM((tm, dim_p), jnp.float32)],
            ),
            compiler_params=pltpu.CompilerParams(
                dimension_semantics=("parallel", "arbitrary"),
                vmem_limit_bytes=vmem_limit,
            ),
            cost_estimate=cost,
        )(x2d, w1p, b1p, w2p, b2p)

    if M_p != M or dim_p != dim:
        out2d = out2d[:M, :dim]
    return out2d.reshape(B, S, dim)


# ----------------------------------------------------------------------------- testing
def _reference(x, w1, b1, w2, b2):
    xf = x.astype(jnp.float32)
    h = jnp.dot(xf, w1.astype(jnp.float32)) + b1.astype(jnp.float32)
    h = 0.5 * h * (1.0 + lax.erf(h / jnp.sqrt(2.0)))
    return jnp.dot(h, w2.astype(jnp.float32)) + b2.astype(jnp.float32)


def _make_inputs(key, B, S, dim, hidden, dtype):
    kx, k1, k2, k3, k4 = jax.random.split(key, 5)
    lim1 = 1.0 / math.sqrt(dim)
    lim2 = 1.0 / math.sqrt(hidden)
    x = jax.random.normal(kx, (B, S, dim), dtype=jnp.float32)
    w1 = jax.random.uniform(k1, (dim, hidden), minval=-lim1, maxval=lim1)
    b1 = jax.random.uniform(k2, (hidden,), minval=-lim1, maxval=lim1)
    w2 = jax.random.uniform(k3, (hidden, dim), minval=-lim2, maxval=lim2)
    b2 = jax.random.uniform(k4, (dim,), minval=-lim2, maxval=lim2)
    cast = lambda a: a.astype(dtype)
    return cast(x), cast(w1), cast(b1), cast(w2), cast(b2)


if __name__ == "__main__":
    key = jax.random.PRNGKey(0)
    ks = jax.random.split(key, 5)

    # Case 1: aligned dims -> fused path, no padding copies at all.
    x, w1, b1, w2, b2 = _make_inputs(ks[0], 2, 8, 128, 256, jnp.float32)
    out = jax.block_until_ready(feed_forward(x, w1, b1, w2, b2))
    ref = _reference(x, w1, b1, w2, b2)
    assert out.shape == (2, 8, 128)
    assert jnp.allclose(out, ref, atol=2e-5, rtol=2e-5), "mismatch (case 1: aligned fused)"

    # Case 2: non-128-aligned dims -> padding path (still fused).
    x, w1, b1, w2, b2 = _make_inputs(ks[1], 2, 10, 48, 200, jnp.float32)
    out = jax.block_until_ready(feed_forward(x, w1, b1, w2, b2))
    ref = _reference(x, w1, b1, w2, b2)
    assert out.shape == (2, 10, 48)
    assert jnp.allclose(out, ref, atol=2e-5, rtol=2e-5), "mismatch (case 2: padded fused)"

    # Case 3: hidden-tiled fallback (accumulator + resident-b1 in-kernel slicing).
    x, w1, b1, w2, b2 = _make_inputs(ks[2], 2, 8, 64, 384, jnp.float32)
    out = jax.block_until_ready(feed_forward(x, w1, b1, w2, b2, th=128, force_tiled=True))
    ref = _reference(x, w1, b1, w2, b2)
    assert jnp.allclose(out, ref, atol=2e-5, rtol=2e-5), "mismatch (case 3: hidden tiled)"

    # Case 4: bf16 storage fast path (bf16 MXU operands, f32 accumulation).
    x, w1, b1, w2, b2 = _make_inputs(ks[3], 2, 8, 128, 256, jnp.bfloat16)
    out = jax.block_until_ready(feed_forward(x, w1, b1, w2, b2))
    ref = _reference(x, w1, b1, w2, b2)
    assert jnp.allclose(out.astype(jnp.float32), ref, atol=5e-2, rtol=5e-2), \
        "mismatch (case 4: bf16)"

    # Case 5: multiple row tiles (megacore-splittable grid, weights resident across tiles).
    x, w1, b1, w2, b2 = _make_inputs(ks[4], 2, 512, 128, 256, jnp.float32)
    out = jax.block_until_ready(feed_forward(x, w1, b1, w2, b2))
    ref = _reference(x, w1, b1, w2, b2)
    assert jnp.allclose(out, ref, atol=2e-5, rtol=2e-5), "mismatch (case 5: multi-tile)"

    print("KERNEL_OK")
</pallas_src>

<mosaic_0001>
module attributes {stable_mosaic.version = 11 : i64} {
  func.func @_ff_fused_kernel(%arg0: i32, %arg1: memref<16x128xf32, #tpu.memory_space<vmem>>, %arg2: memref<128x256xf32, #tpu.memory_space<vmem>>, %arg3: memref<1x256xf32, #tpu.memory_space<vmem>>, %arg4: memref<256x128xf32, #tpu.memory_space<vmem>>, %arg5: memref<1x128xf32, #tpu.memory_space<vmem>>, %arg6: memref<16x128xf32, #tpu.memory_space<vmem>>) attributes {dimension_semantics = [#tpu.dimension_semantics<parallel>], iteration_bounds = array<i64: 1>, scalar_prefetch = 0 : i64, scratch_operands = 0 : i64, tpu.core_type = #tpu.core_type<tc>, window_params = [{transform_indices = @transform_0, window_bounds = array<i64: 16, 128>}, {pipeline_mode = #tpu.pipeline_mode<synchronous>, transform_indices = @transform_1, window_bounds = array<i64: 128, 256>}, {pipeline_mode = #tpu.pipeline_mode<synchronous>, transform_indices = @transform_2, window_bounds = array<i64: 1, 256>}, {pipeline_mode = #tpu.pipeline_mode<synchronous>, transform_indices = @transform_3, window_bounds = array<i64: 256, 128>}, {pipeline_mode = #tpu.pipeline_mode<synchronous>, transform_indices = @transform_4, window_bounds = array<i64: 1, 128>}, {transform_indices = @transform_5, window_bounds = array<i64: 16, 128>}]} {
    %c0 = arith.constant 0 : index
    %c0_0 = arith.constant 0 : index
    %0 = vector.load %arg1[%c0, %c0_0] : memref<16x128xf32, #tpu.memory_space<vmem>>, vector<16x128xf32>
    %c0_1 = arith.constant 0 : index
    %c0_2 = arith.constant 0 : index
    %1 = vector.load %arg2[%c0_1, %c0_2] : memref<128x256xf32, #tpu.memory_space<vmem>>, vector<128x256xf32>
    %cst = arith.constant dense<0.000000e+00> : vector<16x256xf32>
    %2 = tpu.matmul %0, %1, %cst {dimension_numbers = #tpu.dot_dimension_numbers<[1], [0], [0], [1], [0, 0, 1, 1], [], []>} : vector<16x128xf32>, vector<128x256xf32>, vector<16x256xf32> -> vector<16x256xf32>
    %c0_3 = arith.constant 0 : index
    %c0_4 = arith.constant 0 : index
    %3 = vector.load %arg3[%c0_3, %c0_4] : memref<1x256xf32, #tpu.memory_space<vmem>>, vector<1x256xf32>
    %4 = vector.broadcast %3 : vector<1x256xf32> to vector<16x256xf32>
    %5 = arith.addf %2, %4 : vector<16x256xf32>
    %cst_5 = arith.constant 5.000000e-01 : f32
    %6 = vector.broadcast %cst_5 : f32 to vector<16x256xf32>
    %7 = arith.mulf %6, %5 : vector<16x256xf32>
    %cst_6 = arith.constant 0.707106769 : f32
    %8 = vector.broadcast %cst_6 : f32 to vector<16x256xf32>
    %9 = arith.mulf %5, %8 : vector<16x256xf32>
    %10 = math.erf %9 : vector<16x256xf32>
    %cst_7 = arith.constant 1.000000e+00 : f32
    %11 = vector.broadcast %cst_7 : f32 to vector<16x256xf32>
    %12 = arith.addf %11, %10 : vector<16x256xf32>
    %13 = arith.mulf %7, %12 : vector<16x256xf32>
    %c0_8 = arith.constant 0 : index
    %c0_9 = arith.constant 0 : index
    %14 = vector.load %arg4[%c0_8, %c0_9] : memref<256x128xf32, #tpu.memory_space<vmem>>, vector<256x128xf32>
    %cst_10 = arith.constant dense<0.000000e+00> : vector<16x128xf32>
    %15 = tpu.matmul %13, %14, %cst_10 {dimension_numbers = #tpu.dot_dimension_numbers<[1], [0], [0], [1], [0, 0, 1, 1], [], []>} : vector<16x256xf32>, vector<256x128xf32>, vector<16x128xf32> -> vector<16x128xf32>
    %c0_11 = arith.constant 0 : index
    %c0_12 = arith.constant 0 : index
    %16 = vector.load %arg5[%c0_11, %c0_12] : memref<1x128xf32, #tpu.memory_space<vmem>>, vector<1x128xf32>
    %17 = vector.broadcast %16 : vector<1x128xf32> to vector<16x128xf32>
    %18 = arith.addf %15, %17 : vector<16x128xf32>
    %c0_13 = arith.constant 0 : index
    %c0_14 = arith.constant 0 : index
    %19 = vector.load %arg6[%c0_13, %c0_14] : memref<16x128xf32, #tpu.memory_space<vmem>>, vector<16x128xf32>
    tpu.vector_store %arg6[%c0_13, %c0_14], %18 {strides = array<i32>} : memref<16x128xf32, #tpu.memory_space<vmem>>, vector<16x128xf32>,
    return
  }
  func.func @transform_0(%arg0: i32) -> (i32, i32) {
    %c0_i32 = arith.constant 0 : i32
    %c0_i32_0 = arith.constant 0 : i32
    return %arg0, %c0_i32 : i32, i32
  }
  func.func @transform_1(%arg0: i32) -> (i32, i32) {
    %c0_i32 = arith.constant 0 : i32
    %c0_i32_0 = arith.constant 0 : i32
    %c0_i32_1 = arith.constant 0 : i32
    return %c0_i32, %c0_i32_0 : i32, i32
  }
  func.func @transform_2(%arg0: i32) -> (i32, i32) {
    %c0_i32 = arith.constant 0 : i32
    %c0_i32_0 = arith.constant 0 : i32
    %c0_i32_1 = arith.constant 0 : i32
    return %c0_i32, %c0_i32_0 : i32, i32
  }
  func.func @transform_3(%arg0: i32) -> (i32, i32) {
    %c0_i32 = arith.constant 0 : i32
    %c0_i32_0 = arith.constant 0 : i32
    %c0_i32_1 = arith.constant 0 : i32
    return %c0_i32, %c0_i32_0 : i32, i32
  }
  func.func @transform_4(%arg0: i32) -> (i32, i32) {
    %c0_i32 = arith.constant 0 : i32
    %c0_i32_0 = arith.constant 0 : i32
    %c0_i32_1 = arith.constant 0 : i32
    return %c0_i32, %c0_i32_0 : i32, i32
  }
  func.func @transform_5(%arg0: i32) -> (i32, i32) {
    %c0_i32 = arith.constant 0 : i32
    %c0_i32_0 = arith.constant 0 : i32
    return %arg0, %c0_i32 : i32, i32
  }
}

</mosaic_0001>

<bundles_post_ra>
// kernel: tpu_custom_call.1
= control target key start
LH: loop header
LB: loop body
LE: loop exit
PB: predicated region body
PF: predicated region fallthrough
CT: control target
= control target key end

     0   :  { %10 = vsyncpa [#allocation3], 0  ;;  %s549_s0 = inlined_call_operand.hbm [shape: f32[16,128], index: 0, kind: input, shape index: {}]   ;;  %s550_s1 = inlined_call_operand.hbm [shape: f32[128,256], index: 1, kind: input, shape index: {}]   ;;  %s551_s2 = inlined_call_operand.vmem [shape: f32[1,256], index: 2, kind: input, shape index: {}]   ;;  %s552_s3 = inlined_call_operand.hbm [shape: f32[256,128], index: 3, kind: input, shape index: {}]   ;;  %s553_s4 = inlined_call_operand.vmem [shape: f32[1,128], index: 4, kind: input, shape index: {}]   ;;  %s554_s5 = inlined_call_operand.hbm [shape: f32[16,128], index: 5, kind: output, shape index: {}]  }
   0x1   :  { %11 = vsyncpa [#allocation6], 0 }
   0x2   :  { %12 = vsyncpa [#allocation4], 0  ;;  %s481_s18 = smov [#allocation5]  }
   0x3   :  { %s30_s19 = sshll.u32 %s481_s18, 4  ;;  %s31_s19 = int_to_ptr.vmem [resolvable:$true] %s30_s19 }
   0x4   :  { %s403_s20 = scalar_lea.vmem %s31_s19, 4096  ;;  %p408_p1 = scmp.lt.s32.totalorder %s31_s19, %s31_s19 }
   0x5   :  { %p404_p0 = scmp.ne.s32.totalorder %s31_s19, %s403_s20  ;;  %p409_p2 = scmp.lt.s32.totalorder %s403_s20, %s403_s20 }
   0x7   :  { %p410_p3 = por %p409_p2, %p408_p1 }
   0x9   :  { %p411_p4 = pnand %p410_p3, %p404_p0 }
   0xb   :  { %414 = shalt.err (!%p411_p4)
}
   0xc   :  { %s482_s21 = smov 256   ;;  %s483_s22 = smov 16  }
   0xd   :  { %36 = dma.hbm_to_vmem [thread:$0]  %s550_s1, 4096, %s31_s19, [#allocation6], %s482_s21, %s482_s21, %s483_s22  }
   0xe   :  { %s484_s25 = smov [#allocation2]  }
   0xf   :  { %s18_s26 = sshll.u32 %s484_s25, 4  ;;  %s19_s26 = int_to_ptr.vmem [resolvable:$true] %s18_s26 }
  0x10   :  { %s423_s27 = scalar_lea.vmem %s19_s26, 256  ;;  %p428_p6 = scmp.lt.s32.totalorder %s19_s26, %s19_s26 }
  0x11   :  { %p424_p5 = scmp.ne.s32.totalorder %s19_s26, %s423_s27  ;;  %p429_p7 = scmp.lt.s32.totalorder %s423_s27, %s423_s27 }
  0x13   :  { %p430_p8 = por %p429_p7, %p428_p6 }
  0x15   :  { %p431_p9 = pnand %p430_p8, %p424_p5 }
  0x17   :  { %434 = shalt.err (!%p431_p9)
}
  0x18   :  { %s485_s28 = smov 128   ;;  %s486_s29 = smov 8  }
  0x19   :  { %24 = dma.hbm_to_vmem [thread:$0]  %s549_s0, 256, %s19_s26, [#allocation3], %s485_s28, %s485_s28, %s486_s29  }
  0x1a   :  { %s487_s1 = smov [#allocation7]  }
  0x1b   :  { %s44_s7 = sshll.u32 %s487_s1, 4  ;;  %s45_s7 = int_to_ptr.vmem [resolvable:$true] %s44_s7 }
  0x1c   :  { %s443_s8 = scalar_lea.vmem %s45_s7, 4096  ;;  %p448_p11 = scmp.lt.s32.totalorder %s45_s7, %s45_s7 }
  0x1d   :  { %p444_p10 = scmp.ne.s32.totalorder %s45_s7, %s443_s8  ;;  %p449_p12 = scmp.lt.s32.totalorder %s443_s8, %s443_s8 }
  0x1f   :  { %p450_p13 = por %p449_p12, %p448_p11 }
  0x21   :  { %p451_p0 = pnand %p450_p13, %p444_p10 }
  0x23   :  { %454 = shalt.err (!%p451_p0)
}
  0x24   :  { %50 = dma.hbm_to_vmem [thread:$0]  %s552_s3, 4096, %s45_s7, [#allocation6], %s485_s28, %s485_s28, %s486_s29  }
  0x25   :  { %475 = dma.done.wait [#allocation3], 256  }
  0x26   :  { %476 = vsyncadd [#allocation3], 4294967040 }
  0x27   :  { %477 = dma.done.wait [#allocation6], 8192  }
  0x28   :  { %478 = vsyncadd [#allocation6], 4294959104  ;;  %v488_v0 = vmov 0.0   ;;  %v95_v1 = vld [vmem:[#allocation5 + $0xf8] sm:$0xff]  ;;  %v94_v2 = vld [vmem:[#allocation5 + $0xf0] sm:$0xff]  ;;  %s489_s12 = smov [#allocation8]  }
  0x29   :  { %172 = vmatprep.mubr.f32.mxu0 %v488_v0  ;;  %v93_v3 = vld [vmem:[#allocation5 + $0xe8] sm:$0xff]  ;;  %108 = vmatprep.subr.mxu0 %v95_v1  ;;  %v92_v4 = vld [vmem:[#allocation5 + $0xe0] sm:$0xff]  ;;  %v91_v5 = vld [vmem:[#allocation5 + $0xd8] sm:$0xff]  ;;  %s326_s13 = sshll.u32 %s489_s12, 4  ;;  %s327_s13 = int_to_ptr.vmem [resolvable:$true] %s326_s13 }
  0x2a   :  { %109 = vmatpush1.msra.mxu0 %v94_v2  ;;  %v90_v6 = vld [vmem:[#allocation5 + $0xd0] sm:$0xff]  ;;  %v89_v7 = vld [vmem:[#allocation5 + $0xc8] sm:$0xff]  ;;  %v88_v8 = vld [vmem:[#allocation5 + $0xc0] sm:$0xff]  ;;  %s455_s14 = scalar_lea.vmem %s327_s13, 256  ;;  %p460_p2 = scmp.lt.s32.totalorder %s327_s13, %s327_s13 }
  0x2b   :  { %110 = vmatprep.subr.mxu0 %v93_v3  ;;  %v87_v9 = vld [vmem:[#allocation5 + $0xb8] sm:$0xff]  ;;  %v86_v10 = vld [vmem:[#allocation5 + $0xb0] sm:$0xff]  ;;  %v85_v11 = vld [vmem:[#allocation5 + $0xa8] sm:$0xff]  ;;  %v98_v3 = vlaneseq  ;;  %p456_p1 = scmp.ne.s32.totalorder %s327_s13, %s455_s14  ;;  %p461_p3 = scmp.lt.s32.totalorder %s455_s14, %s455_s14 }
  0x2c   :  { %111 = vmatpush1.msra.mxu0 %v92_v4  ;;  %v84_v12 = vld [vmem:[#allocation5 + $0xa0] sm:$0xff]  ;;  %v83_v13 = vld [vmem:[#allocation5 + $0x98] sm:$0xff]  ;;  %v82_v14 = vld [vmem:[#allocation5 + $0x90] sm:$0xff] }
  0x2d   :  { %112 = vmatprep.subr.mxu0 %v91_v5  ;;  %v236_v15 = vld [vmem:[#allocation7 + $0xf8] sm:$0xff]  ;;  %v81_v17 = vld [vmem:[#allocation5 + $0x88] sm:$0xff]  ;;  %v235_v18 = vld [vmem:[#allocation7 + $0xf0] sm:$0xff]  ;;  %v99_v4 = vshrl.u32 %v98_v3, 7  ;;  %p462_p4 = por %p461_p3, %p460_p2 }
  0x2e   :  { %113 = vmatpush1.msra.mxu0 %v90_v6  ;;  %v220_v16 = vld [vmem:[#allocation7 + $0x78] sm:$0xff]  ;;  %340 = vmatprep.subr.mxu1 %v236_v15  ;;  %v219_v19 = vld [vmem:[#allocation7 + $0x70] sm:$0xff]  ;;  %v80_v20 = vld [vmem:[#allocation5 + $0x80] sm:$0xff] }
  0x2f   :  { %114 = vmatprep.subr.mxu0 %v89_v7  ;;  %341 = vmatpush3.msra.mxu1 %v220_v16  ;;  %v234_v21 = vld [vmem:[#allocation7 + $0xe8] sm:$0xff]  ;;  %v79_v22 = vld [vmem:[#allocation5 + $0x78] sm:$0xff]  ;;  %v78_v24 = vld [vmem:[#allocation5 + $0x70] sm:$0xff]  ;;  %v100_v5 = vsub.s32 0, %v99_v4  ;;  %v104_v7 = vsub.s32 1, %v99_v4  ;;  %p463_p5 = pnand %p462_p4, %p456_p1 }
  0x30   :  { %115 = vmatpush1.msra.mxu0 %v88_v8  ;;  %342 = vmatprep.subr.mxu1 %v235_v18  ;;  %v218_v23 = vld [vmem:[#allocation7 + $0x68] sm:$0xff]  ;;  %v76_v26 = vld [vmem:[#allocation5 + $0x60] sm:$0xff]  ;;  %v75_v27 = vld [vmem:[#allocation5 + $0x58] sm:$0xff] }
  0x31   :  { %116 = vmatprep.subr.mxu0 %v87_v9  ;;  %343 = vmatpush3.msra.mxu1 %v219_v19  ;;  %v77_v25 = vld [vmem:[#allocation5 + $0x68] sm:$0xff]  ;;  %v74_v28 = vld [vmem:[#allocation5 + $0x50] sm:$0xff]  ;;  %v72_v30 = vld [vmem:[#allocation5 + $0x40] sm:$0xff] }
  0x32   :  { %117 = vmatpush1.msra.mxu0 %v86_v10  ;;  %344 = vmatprep.subr.mxu1 %v234_v21  ;;  %v73_v29 = vld [vmem:[#allocation5 + $0x48] sm:$0xff]  ;;  %v71_v31 = vld [vmem:[#allocation5 + $0x38] sm:$0xff]  ;;  %v70_v32 = vld [vmem:[#allocation5 + $0x30] sm:$0xff] }
  0x33   :  { %118 = vmatprep.subr.mxu0 %v85_v11  ;;  %345 = vmatpush3.msra.mxu1 %v218_v23  ;;  %v69_v33 = vld [vmem:[#allocation5 + $0x28] sm:$0xff]  ;;  %v68_v34 = vld [vmem:[#allocation5 + $0x20] sm:$0xff]  ;;  %v67_v35 = vld [vmem:[#allocation5 + $0x18] sm:$0xff] }
  0x34   :  { %119 = vmatpush1.msra.mxu0 %v84_v12  ;;  %v66_v36 = vld [vmem:[#allocation5 + $0x10] sm:$0xff]  ;;  %v65_v37 = vld [vmem:[#allocation5 + $0x8] sm:$0xff]  ;;  %v64_v38 = vld [vmem:[#allocation5] sm:$0xff] }
  0x35   :  { %120 = vmatprep.subr.mxu0 %v83_v13  ;;  %v62_v39 = vld [vmem:[#allocation2] sm:$0xff]  ;;  %v63_v40 = vld [vmem:[#allocation2 + $0x8] sm:$0xff]  ;;  %v233_v41 = vld [vmem:[#allocation7 + $0xe0] sm:$0xff] }
  0x36   :  { %121 = vmatpush1.msra.mxu0 %v82_v14  ;;  %346 = vmatprep.subr.mxu1 %v233_v41  ;;  %v217_v42 = vld [vmem:[#allocation7 + $0x60] sm:$0xff]  ;;  %v232_v43 = vld [vmem:[#allocation7 + $0xd8] sm:$0xff]  ;;  %v231_v45 = vld [vmem:[#allocation7 + $0xd0] sm:$0xff] }
  0x37   :  { %122 = vmatprep.subr.mxu0 %v81_v17  ;;  %347 = vmatpush3.msra.mxu1 %v217_v42  ;;  %v216_v44 = vld [vmem:[#allocation7 + $0x58] sm:$0xff]  ;;  %v215_v46 = vld [vmem:[#allocation7 + $0x50] sm:$0xff]  ;;  %v230_v47 = vld [vmem:[#allocation7 + $0xc8] sm:$0xff] }
  0x38   :  { %123 = vmatpush1.msra.mxu0 %v80_v20  ;;  %348 = vmatprep.subr.mxu1 %v232_v43  ;;  %v214_v48 = vld [vmem:[#allocation7 + $0x48] sm:$0xff]  ;;  %v229_v49 = vld [vmem:[#allocation7 + $0xc0] sm:$0xff]  ;;  %v228_v51 = vld [vmem:[#allocation7 + $0xb8] sm:$0xff] }
  0x39   :  { %124 = vmatprep.subr.mxu0 %v79_v22  ;;  %349 = vmatpush3.msra.mxu1 %v216_v44  ;;  %v213_v50 = vld [vmem:[#allocation7 + $0x40] sm:$0xff]  ;;  %v212_v52 = vld [vmem:[#allocation7 + $0x38] sm:$0xff]  ;;  %v227_v53 = vld [vmem:[#allocation7 + $0xb0] sm:$0xff] }
  0x3a   :  { %125 = vmatpush1.msra.mxu0 %v78_v24  ;;  %350 = vmatprep.subr.mxu1 %v231_v45  ;;  %v211_v54 = vld [vmem:[#allocation7 + $0x30] sm:$0xff]  ;;  %v226_v55 = vld [vmem:[#allocation7 + $0xa8] sm:$0xff]  ;;  %v225_v57 = vld [vmem:[#allocation7 + $0xa0] sm:$0xff] }
  0x3b   :  { %126 = vmatprep.subr.mxu0 %v77_v25  ;;  %351 = vmatpush3.msra.mxu1 %v215_v46  ;;  %v210_v56 = vld [vmem:[#allocation7 + $0x28] sm:$0xff]  ;;  %v209_v58 = vld [vmem:[#allocation7 + $0x20] sm:$0xff]  ;;  %v224_v59 = vld [vmem:[#allocation7 + $0x98] sm:$0xff] }
  0x3c   :  { %127 = vmatpush1.msra.mxu0 %v76_v26  ;;  %352 = vmatprep.subr.mxu1 %v230_v47  ;;  %v208_v60 = vld [vmem:[#allocation7 + $0x18] sm:$0xff]  ;;  %v223_v61 = vld [vmem:[#allocation7 + $0x90] sm:$0xff]  ;;  %v222_v63 = vld [vmem:[#allocation7 + $0x88] sm:$0xff] }
  0x3d   :  { %128 = vmatprep.subr.mxu0 %v75_v27  ;;  %353 = vmatpush3.msra.mxu1 %v214_v48  ;;  %v207_v62 = vld [vmem:[#allocation7 + $0x10] sm:$0xff]  ;;  %v221_v1 = vld [vmem:[#allocation7 + $0x80] sm:$0xff] }
  0x3e   :  { %129 = vmatpush1.msra.mxu0 %v74_v28  ;;  %354 = vmatprep.subr.mxu1 %v229_v49  ;;  %v205_v2 = vld [vmem:[#allocation7] sm:$0xff]  ;;  %v96_v6 = vld [vmem:[%s551_s2] sm:$0x3] }
  0x3f   :  { %130 = vmatprep.subr.mxu0 %v73_v29  ;;  %355 = vmatpush3.msra.mxu1 %v213_v50  ;;  %v101_v8 = vrot.slane %v96_v6, %v100_v5  ;;  %v105_v9 = vrot.slane %v96_v6, %v104_v7 }
  0x40   :  { %131 = vmatpush1.msra.mxu0 %v72_v30  ;;  %356 = vmatprep.subr.mxu1 %v228_v51 }
  0x41   :  { %132 = vmatprep.subr.mxu0 %v71_v31  ;;  %357 = vmatpush3.msra.mxu1 %v212_v52 }
  0x42   :  { %133 = vmatpush1.msra.mxu0 %v70_v32  ;;  %358 = vmatprep.subr.mxu1 %v227_v53 }
  0x43   :  { %134 = vmatprep.subr.mxu0 %v69_v33  ;;  %359 = vmatpush3.msra.mxu1 %v211_v54 }
  0x44   :  { %135 = vmatpush1.msra.mxu0 %v68_v34  ;;  %360 = vmatprep.subr.mxu1 %v226_v55 }
  0x45   :  { %136 = vmatprep.subr.mxu0 %v67_v35  ;;  %361 = vmatpush3.msra.mxu1 %v210_v56 }
  0x46   :  { %137 = vmatpush1.msra.mxu0 %v66_v36  ;;  %362 = vmatprep.subr.mxu1 %v225_v57 }
  0x47   :  { %138 = vmatprep.subr.mxu0 %v65_v37  ;;  %363 = vmatpush3.msra.mxu1 %v209_v58 }
  0x48   :  { %139 = vmatpush1.msra.mxu0 %v64_v38  ;;  %364 = vmatprep.subr.mxu1 %v224_v59 }
  0x49   :  { %173 = vmatmul.mubr.f32.vlgmr.msra.gmra.mxu0 %v62_v39  ;;  %365 = vmatpush3.msra.mxu1 %v208_v60  ;;  %v339_v39 = vld [vmem:[%s553_s4] ss:$0 sm:$0xff] }
  0x4a   :  { %178 = vmatprep.mubr.f32.mxu0 %v488_v0  ;;  %366 = vmatprep.subr.mxu1 %v223_v61  ;;  %v206_v0 = vld [vmem:[#allocation7 + $0x8] sm:$0xff] }
  0x4b   :  { %367 = vmatpush3.msra.mxu1 %v207_v62 }
  0x4c   :  { %368 = vmatprep.subr.mxu1 %v222_v63 }
  0x4d   :  { %179 = vmatmul.mubr.f32.gmra.mxu0 %v63_v40  ;;  %369 = vmatpush3.msra.mxu1 %v206_v0 }
  0x4e   :  { %370 = vmatprep.subr.mxu1 %v221_v1 }
  0x4f   :  { %371 = vmatpush3.msra.mxu1 %v205_v2 }
 0x109   :  { %v174_v10 = vpop.f32.mrf.mxu0 }
 0x10a   :  { %v175_v11 = vadd.f32 %v174_v10, %v101_v8 }
 0x10b   :  { %v176_v12 = vpop.f32.mrf.mxu0 }
 0x10c   :  { %v189_v13 = vmul.f32 0.70710677, %v175_v11  ;;  %v177_v14 = vadd.f32 %v176_v12, %v105_v9  ;;  %v185_v28 = vmul.f32 0.5, %v175_v11 }
 0x10d   :  { %v180_v15 = vpop.f32.mrf.mxu0 }
 0x10e   :  { %387 = verf.f32 %v189_v13  ;;  %v190_v16 = vmul.f32 0.70710677, %v177_v14  ;;  %v181_v17 = vadd.f32 %v180_v15, %v101_v8  ;;  %v186_v25 = vmul.f32 0.5, %v177_v14 }
 0x10f   :  { %v182_v18 = vpop.f32.mrf.mxu0 }
 0x110   :  { %389 = verf.f32 %v190_v16  ;;  %v191_v19 = vmul.f32 0.70710677, %v181_v17  ;;  %v183_v20 = vadd.f32 %v182_v18, %v105_v9  ;;  %v187_v35 = vmul.f32 0.5, %v181_v17 }
 0x112   :  { %391 = verf.f32 %v191_v19  ;;  %v192_v21 = vmul.f32 0.70710677, %v183_v20  ;;  %v188_v33 = vmul.f32 0.5, %v183_v20 }
 0x114   :  { %393 = verf.f32 %v192_v21 }
 0x11b   :  { %v388_v22 = vpop.eup %387 }
 0x11c   :  { %v197_v24 = vadd.f32 1.0, %v388_v22 }
 0x11d   :  { %v390_v23 = vpop.eup %389 }
 0x11e   :  { %v198_v26 = vadd.f32 1.0, %v390_v23  ;;  %v201_v31 = vmul.f32 %v197_v24, %v185_v28 }
 0x11f   :  { %v392_v27 = vpop.eup %391 }
 0x120   :  { %v202_v29 = vmul.f32 %v198_v26, %v186_v25  ;;  %v199_v32 = vadd.f32 1.0, %v392_v27 }
 0x121   :  { %v394_v30 = vpop.eup %393 }
 0x122   :  { %308 = vmatprep.mubr.f32.mxu1 %v202_v29  ;;  %v200_v34 = vadd.f32 1.0, %v394_v30  ;;  %v203_v37 = vmul.f32 %v199_v32, %v187_v35 }
 0x123   :  { %309 = vmatmul.mubr.f32.vlgmr.msra.gmra.mxu1 %v201_v31 }
 0x124   :  { %v204_v36 = vmul.f32 %v200_v34, %v188_v33 }
 0x126   :  { %313 = vmatprep.mubr.f32.mxu1 %v204_v36 }
 0x127   :  { %314 = vmatmul.mubr.f32.gmra.mxu1 %v203_v37 }
 0x1e3   :  { %v372_v38 = vpop.f32.mrf.mxu1 }
 0x1e5   :  { %v373_v40 = vpop.f32.mrf.mxu1 }
 0x1e6   :  { %v374_v41 = vadd.f32 %v373_v40, %v372_v38 }
 0x1e7   :  { %v375_v42 = vpop.f32.mrf.mxu1 }
 0x1e8   :  { %v311_v43 = vadd.f32 %v374_v41, %v339_v39 }
 0x1e9   :  { %v376_v44 = vpop.f32.mrf.mxu1 }
 0x1ea   :  { %319 = vst [vmem:[#allocation8] sm:$0xff] %v311_v43  ;;  %v377_v45 = vadd.f32 %v376_v44, %v375_v42 }
 0x1ec   :  { %v316_v46 = vadd.f32 %v377_v45, %v339_v39 }
 0x1ee   :  { %320 = vst [vmem:[#allocation8 + $0x8] sm:$0xff] %v316_v46 }
 0x1ef   :  { %466 = shalt.err (!%p463_p5)
}
 0x1f0   :  { %332 = dma.vmem_to_hbm [thread:$0]  %s327_s13, 256, %s554_s5, [#allocation4], %s485_s28, %s485_s28, %s486_s29  }
 0x1f1   :  { %479 = dma.done.wait [#allocation4], 256  }
 0x1f2   :  { %480 = vsyncadd [#allocation4], 4294967040 }
 0x1f3   :  { %336 = vsyncpa [#allocation3], 1 }
 0x1f4   :  { %337 = vsyncpa [#allocation6], 1 }
 0x1f5   :  { %338 = vsyncpa [#allocation4], 1 }

</bundles_post_ra>
